<compile_context>
chip_gen: v6e
topology: v6e:2x2x1
jax: 0.10.0
libtpu: 0.0.40
codegen_flags: <defaults>
</compile_context>

<pallas_src>
import functools

import jax
import jax.numpy as jnp
from jax.experimental import pallas as pl
from jax.experimental.pallas import tpu as pltpu


_VMEM_LIMIT = 32 * 1024 * 1024        # explicit scoped-VMEM budget (safe on v5e/v6e/v7x)
_FUSED_VMEM_BUDGET = 20 * 1024 * 1024  # guard for resident-weight fused kernels


# ---------------------------------------------------------------------------
# Padding / tiling helpers (wrapper-side glue).
# ---------------------------------------------------------------------------
def _round_up(v, m):
    return ((v + m - 1) // m) * m


def _pad_to(x, r0, r1):
    """Zero-pad a 2-D array up to shape (r0, r1); no-op (no copy) if already there."""
    p0, p1 = r0 - x.shape[0], r1 - x.shape[1]
    if p0 or p1:
        x = jnp.pad(x, ((0, p0), (0, p1)))
    return x


def _pick_tile(padded_dim, target):
    """Largest tile <= target that divides padded_dim (padded_dim is a 128-multiple)."""
    t = min(target, padded_dim)
    while padded_dim % t:
        t //= 2
    return t


# ---------------------------------------------------------------------------
# Kernel 1: generic tiled matmul with optional fused ReLU epilogue.
#   grid = (M//tm, N//tn, K//tk), fp32 accumulator in VMEM scratch.
# ---------------------------------------------------------------------------
def _mm_kernel(a_ref, b_ref, o_ref, acc_ref, *, relu):
    @pl.when(pl.program_id(2) == 0)
    def _init():
        acc_ref[...] = jnp.zeros_like(acc_ref)

    acc_ref[...] += jnp.dot(a_ref[...], b_ref[...],
                            preferred_element_type=jnp.float32)

    @pl.when(pl.program_id(2) == pl.num_programs(2) - 1)
    def _finalize():
        r = acc_ref[...]
        if relu:
            r = jnp.maximum(r, 0.0)
        o_ref[...] = r.astype(o_ref.dtype)


def matmul_tiles(a, b, *, relu, out_dtype, tm, tn, tk):
    """a:(M,K), b:(K,N), already padded so tm|M, tn|N, tk|K. Returns (M,N)."""
    M, K = a.shape
    K2, N = b.shape
    assert K == K2 and M % tm == 0 and N % tn == 0 and K % tk == 0
    grid = (M // tm, N // tn, K // tk)
    return pl.pallas_call(
        functools.partial(_mm_kernel, relu=relu),
        out_shape=jax.ShapeDtypeStruct((M, N), out_dtype),
        grid_spec=pltpu.PrefetchScalarGridSpec(
            num_scalar_prefetch=0,
            grid=grid,
            in_specs=[
                pl.BlockSpec((tm, tk), lambda i, j, k: (i, k)),
                pl.BlockSpec((tk, tn), lambda i, j, k: (k, j)),
            ],
            out_specs=pl.BlockSpec((tm, tn), lambda i, j, k: (i, j)),
            scratch_shapes=[pltpu.VMEM((tm, tn), jnp.float32)],
        ),
        compiler_params=pltpu.CompilerParams(
            dimension_semantics=("parallel", "parallel", "arbitrary"),
            vmem_limit_bytes=_VMEM_LIMIT),
    )(a, b)


# ---------------------------------------------------------------------------
# Kernel 2: fused GraphConv (aggregate-then-project):
#   acc[i] = sum_k adj[i,k] @ x[k, :]            (K-tiled, fp32 accumulator)
#   out[i] = relu(acc[i] @ W^T)                  (epilogue on last K tile)
# ---------------------------------------------------------------------------
def _gconv_fused_kernel(adj_ref, x_ref, wt_ref, o_ref, acc_ref):
    @pl.when(pl.program_id(1) == 0)
    def _init():
        acc_ref[...] = jnp.zeros_like(acc_ref)

    acc_ref[...] += jnp.dot(adj_ref[...], x_ref[...],
                            preferred_element_type=jnp.float32)

    @pl.when(pl.program_id(1) == pl.num_programs(1) - 1)
    def _finalize():
        proj = jnp.dot(acc_ref[...].astype(wt_ref.dtype), wt_ref[...],
                       preferred_element_type=jnp.float32)
        o_ref[...] = jnp.maximum(proj, 0.0).astype(o_ref.dtype)


def gconv_agg_project(adj_p, x_p, wt_p, *, out_dtype, tm, tk):
    Mp, Kp = adj_p.shape
    Fpad = x_p.shape[1]
    Hpad = wt_p.shape[1]
    grid = (Mp // tm, Kp // tk)
    return pl.pallas_call(
        _gconv_fused_kernel,
        out_shape=jax.ShapeDtypeStruct((Mp, Hpad), out_dtype),
        grid_spec=pltpu.PrefetchScalarGridSpec(
            num_scalar_prefetch=0,
            grid=grid,
            in_specs=[
                pl.BlockSpec((tm, tk), lambda i, k: (i, k)),
                pl.BlockSpec((tk, Fpad), lambda i, k: (k, 0)),
                pl.BlockSpec((Fpad, Hpad), lambda i, k: (0, 0)),   # resident weight
            ],
            out_specs=pl.BlockSpec((tm, Hpad), lambda i, k: (i, 0)),
            scratch_shapes=[pltpu.VMEM((tm, Fpad), jnp.float32)],
        ),
        compiler_params=pltpu.CompilerParams(
            dimension_semantics=("parallel", "arbitrary"),
            vmem_limit_bytes=_VMEM_LIMIT),
    )(adj_p, x_p, wt_p)


# ---------------------------------------------------------------------------
# Kernel 3: layer-2 GraphConv fused with the separable edge-score projection:
#   acc[i]    = sum_k adj[i,k] @ h1[k, :]
#   proj      = relu(acc @ W2^T)                  (never written to HBM)
#   scores[i] = proj @ [wa | wb | 0...]           -> (tm, 128) fp32, cols 0/1 used
# ---------------------------------------------------------------------------
def _gconv_score_kernel(adj_ref, h_ref, wt_ref, wab_ref, o_ref, acc_ref):
    @pl.when(pl.program_id(1) == 0)
    def _init():
        acc_ref[...] = jnp.zeros_like(acc_ref)

    acc_ref[...] += jnp.dot(adj_ref[...], h_ref[...],
                            preferred_element_type=jnp.float32)

    @pl.when(pl.program_id(1) == pl.num_programs(1) - 1)
    def _finalize():
        proj = jnp.dot(acc_ref[...].astype(wt_ref.dtype), wt_ref[...],
                       preferred_element_type=jnp.float32)
        proj = jnp.maximum(proj, 0.0)
        # node partial scores: col 0 = h @ wa (src half), col 1 = h @ wb (dst half)
        o_ref[...] = jnp.dot(proj, wab_ref[...],
                             preferred_element_type=jnp.float32)


def gconv_score(adj_p, h_p, w2t_p, wab_p, *, tm, tk):
    Mp, Kp = adj_p.shape
    Hpad = w2t_p.shape[1]
    grid = (Mp // tm, Kp // tk)
    return pl.pallas_call(
        _gconv_score_kernel,
        out_shape=jax.ShapeDtypeStruct((Mp, 128), jnp.float32),
        grid_spec=pltpu.PrefetchScalarGridSpec(
            num_scalar_prefetch=0,
            grid=grid,
            in_specs=[
                pl.BlockSpec((tm, tk), lambda i, k: (i, k)),
                pl.BlockSpec((tk, Hpad), lambda i, k: (k, 0)),
                pl.BlockSpec((Hpad, Hpad), lambda i, k: (0, 0)),   # resident W2^T
                pl.BlockSpec((Hpad, 128), lambda i, k: (0, 0)),    # resident [wa|wb]
            ],
            out_specs=pl.BlockSpec((tm, 128), lambda i, k: (i, 0)),
            scratch_shapes=[pltpu.VMEM((tm, Hpad), jnp.float32)],
        ),
        compiler_params=pltpu.CompilerParams(
            dimension_semantics=("parallel", "arbitrary"),
            vmem_limit_bytes=_VMEM_LIMIT),
    )(adj_p, h_p, w2t_p, wab_p)


# ---------------------------------------------------------------------------
# Kernel 4: per-edge combine: sigmoid(score_src + score_dst + bias), lane-dense.
# ---------------------------------------------------------------------------
def _edge_combine_kernel(pa_ref, pb_ref, b_ref, o_ref):
    o_ref[...] = jax.nn.sigmoid(pa_ref[...] + pb_ref[...] + b_ref[0, 0])


def edge_combine(pa, pb, blin, *, te=2048):
    E = pa.shape[0]
    te = min(te, _round_up(E, 128))
    Epad = _round_up(E, te)
    pa_p = _pad_to(pa.reshape(1, E).astype(jnp.float32), 1, Epad)
    pb_p = _pad_to(pb.reshape(1, E).astype(jnp.float32), 1, Epad)
    b = blin.reshape(1, 1).astype(jnp.float32)
    out = pl.pallas_call(
        _edge_combine_kernel,
        out_shape=jax.ShapeDtypeStruct((1, Epad), jnp.float32),
        grid=(Epad // te,),
        in_specs=[
            pl.BlockSpec((1, te), lambda e: (0, e)),
            pl.BlockSpec((1, te), lambda e: (0, e)),
            pl.BlockSpec(memory_space=pltpu.MemorySpace.SMEM),   # scalar bias
        ],
        out_specs=pl.BlockSpec((1, te), lambda e: (0, e)),
        compiler_params=pltpu.CompilerParams(
            dimension_semantics=("parallel",),
            vmem_limit_bytes=_VMEM_LIMIT),
    )(pa_p, pb_p, b)
    return out[0, :E]


# ---------------------------------------------------------------------------
# GCNLink forward.
# ---------------------------------------------------------------------------
def gcn_link_forward(params, x, adj, edge_index, *, mxu_dtype=jnp.bfloat16):
    w1, w2, wlin, blin = params["w1"], params["w2"], params["wlin"], params["blin"]
    N, Fin = x.shape
    H = w1.shape[0]

    Hpad = _round_up(H, 128)
    Fpad = _round_up(Fin, 128)

    # Shared tiling; cast + zero-pad the N x N adjacency exactly once (both
    # layers stream the same bf16 array, tiles divide Np by construction).
    Np = _round_up(N, 128) if N <= 512 else _round_up(N, 512)
    tm = _pick_tile(Np, 1024)
    tk = _pick_tile(Np, 512)
    adj_p = _pad_to(adj.astype(mxu_dtype), Np, Np)

    # Pre-transposed, padded weights.
    w1t_p = _pad_to(w1.T.astype(mxu_dtype), Fpad, Hpad)
    w2t_p = _pad_to(w2.T.astype(mxu_dtype), Hpad, Hpad)
    # Separable edge score: z @ Wlin^T == (h @ wa)[src] + (h @ wb)[dst].
    wab_p = jnp.zeros((Hpad, 128), jnp.float32)
    wab_p = wab_p.at[:H, 0].set(wlin[0, :H]).at[:H, 1].set(wlin[0, H:])

    # ---- layer 1: GraphConv(Fin -> H), bf16 activation out -----------------
    # TODO(synk): nn.Dropout is identity at inference; training dropout not implemented.
    x_p = _pad_to(x.astype(mxu_dtype), Np, Fpad)
    tn1 = _pick_tile(Hpad, 512)
    if H < Fin:
        # Project first: contract the N x N matmul over the smaller dim.
        tk1 = _pick_tile(Fpad, 512)
        xw = matmul_tiles(x_p, w1t_p, relu=False, out_dtype=mxu_dtype,
                          tm=tm, tn=tn1, tk=tk1)                    # (Np, Hpad) bf16
        h1 = matmul_tiles(adj_p, xw, relu=True, out_dtype=mxu_dtype,
                          tm=tm, tn=tn1, tk=tk)                     # (Np, Hpad) bf16
    else:
        fused1 = (2 * tm * tk * 2 + 2 * tk * Fpad * 2 + Fpad * Hpad * 2
                  + 2 * tm * Hpad * 2 + tm * Fpad * 4)
        if fused1 <= _FUSED_VMEM_BUDGET:
            h1 = gconv_agg_project(adj_p, x_p, w1t_p, out_dtype=mxu_dtype,
                                   tm=tm, tk=tk)
        else:  # resident weight too large: two-pass tiled matmuls
            agg = matmul_tiles(adj_p, x_p, relu=False, out_dtype=mxu_dtype,
                               tm=tm, tn=_pick_tile(Fpad, 512), tk=tk)
            h1 = matmul_tiles(agg, w1t_p, relu=True, out_dtype=mxu_dtype,
                              tm=tm, tn=tn1, tk=_pick_tile(Fpad, 512))

    # ---- layer 2 + fused edge-score projection ------------------------------
    fused2 = (2 * tm * tk * 2 + 2 * tk * Hpad * 2 + Hpad * Hpad * 2
              + Hpad * 128 * 4 + 2 * tm * 128 * 4 + tm * Hpad * 4)
    if fused2 <= _FUSED_VMEM_BUDGET:
        node_scores = gconv_score(adj_p, h1, w2t_p, wab_p, tm=tm, tk=tk)  # (Np,128)
    else:  # VMEM guard for very large hidden_dim (e.g. on v7x): two-pass fallback
        tnh = _pick_tile(Hpad, 512)
        agg2 = matmul_tiles(adj_p, h1, relu=False, out_dtype=mxu_dtype,
                            tm=tm, tn=tnh, tk=tk)
        h2 = matmul_tiles(agg2, w2t_p, relu=True, out_dtype=mxu_dtype,
                          tm=tm, tn=tnh, tk=tnh)
        node_scores = matmul_tiles(h2, wab_p.astype(mxu_dtype), relu=False,
                                   out_dtype=jnp.float32, tm=tm, tn=128, tk=tnh)

    # ---- per-edge: O(E) scalar gathers + add + bias + sigmoid ---------------
    src, dst = edge_index[0], edge_index[1]
    sa = node_scores[:N, 0]          # h @ wa  (src half of Wlin)
    sb = node_scores[:N, 1]          # h @ wb  (dst half of Wlin)
    pa = sa[src]                     # (E,) gathers stay in JAX glue (tiny)
    pb = sb[dst]
    return edge_combine(pa, pb, blin)


def init_params(key, in_dim, hidden_dim):
    k1, k2, k3, k4 = jax.random.split(key, 4)

    def unif(k, shape, fan_in):
        bound = 1.0 / jnp.sqrt(fan_in)
        return jax.random.uniform(k, shape, jnp.float32, -bound, bound)

    return {
        "w1": unif(k1, (hidden_dim, in_dim), in_dim),           # g1.linear.weight
        "w2": unif(k2, (hidden_dim, hidden_dim), hidden_dim),   # g2.linear.weight
        "wlin": unif(k3, (1, 2 * hidden_dim), 2 * hidden_dim),  # lin.weight
        "blin": unif(k4, (1,), 2 * hidden_dim),                 # lin.bias
    }


# ---------------------------------------------------------------------------
# Pure-JAX references.
# ---------------------------------------------------------------------------
def _reference_forward(params, x, adj, edge_index, *, cast_dtype):
    """Mirrors the kernel's cast points / contraction order (cast_dtype=bf16)
    or the original fp32 module math (cast_dtype=float32)."""
    w1, w2, wlin, blin = params["w1"], params["w2"], params["wlin"], params["blin"]

    def gconv(xin, wt):
        Fin, H = wt.shape
        cd = cast_dtype
        if H < Fin:
            xw = jnp.dot(xin.astype(cd), wt.astype(cd),
                         preferred_element_type=jnp.float32).astype(cd)
            h = jnp.dot(adj.astype(cd), xw, preferred_element_type=jnp.float32)
        else:
            agg = jnp.dot(adj.astype(cd), xin.astype(cd),
                          preferred_element_type=jnp.float32)
            h = jnp.dot(agg.astype(cd), wt.astype(cd),
                        preferred_element_type=jnp.float32)
        return jnp.maximum(h, 0.0)

    h1 = gconv(x, w1.T)
    h = gconv(h1, w2.T)
    src, dst = edge_index[0], edge_index[1]
    z = jnp.concatenate([h[src], h[dst]], axis=1)
    return jax.nn.sigmoid(z @ wlin.T + blin).reshape(-1)


if __name__ == "__main__":
    # IN_DIM > HIDDEN so layer 1 exercises the project-first path; layer 2 uses
    # the fused aggregate+project+score kernel. N not a multiple of 8 to
    # exercise padding.
    N, IN_DIM, HIDDEN, E = 20, 32, 16, 10

    key = jax.random.PRNGKey(0)
    kx, kadj, ke, kp = jax.random.split(key, 4)

    x = jax.random.normal(kx, (N, IN_DIM), jnp.float32)
    adj = jax.random.uniform(kadj, (N, N), jnp.float32)   # dense "adjacency"
    edge_index = jax.random.randint(ke, (2, E), 0, N, jnp.int32)
    params = init_params(kp, IN_DIM, HIDDEN)

    out = gcn_link_forward(params, x, adj, edge_index)
    out = jax.block_until_ready(out)

    assert out.shape == (E,)

    # Tight check vs a reference mirroring the bf16-input / fp32-accumulate path.
    ref_bf16 = _reference_forward(params, x, adj, edge_index,
                                  cast_dtype=jnp.bfloat16)
    assert jnp.allclose(out, ref_bf16, atol=5e-3), (out, ref_bf16)

    # Loose check vs the original full-fp32 module semantics.
    ref_f32 = _reference_forward(params, x, adj, edge_index,
                                 cast_dtype=jnp.float32)
    assert jnp.allclose(out, ref_f32, atol=5e-2), (out, ref_f32)

    print("KERNEL_OK")
</pallas_src>

<mosaic_0001>
module attributes {stable_mosaic.version = 11 : i64} {
  func.func @_mm_kernel(%arg0: i32, %arg1: i32, %arg2: i32, %arg3: memref<128x128xbf16, #tpu.memory_space<vmem>>, %arg4: memref<128x128xbf16, #tpu.memory_space<vmem>>, %arg5: memref<128x128xbf16, #tpu.memory_space<vmem>>, %arg6: memref<128x128xf32, #tpu.memory_space<vmem>>) attributes {dimension_semantics = [#tpu.dimension_semantics<parallel>, #tpu.dimension_semantics<parallel>, #tpu.dimension_semantics<arbitrary>], iteration_bounds = array<i64: 1, 1, 1>, scalar_prefetch = 0 : i64, scratch_operands = 1 : i64, tpu.core_type = #tpu.core_type<tc>, window_params = [{transform_indices = @transform_0, window_bounds = array<i64: 128, 128>}, {transform_indices = @transform_1, window_bounds = array<i64: 128, 128>}, {transform_indices = @transform_2, window_bounds = array<i64: 128, 128>}]} {
    %c0_i32 = arith.constant 0 : i32
    %0 = arith.cmpi eq, %arg2, %c0_i32 : i32
    %1 = arith.extui %0 : i1 to i32
    %c0_i32_0 = arith.constant 0 : i32
    %2 = arith.cmpi ne, %1, %c0_i32_0 : i32
    scf.if %2 {
      %cst_10 = arith.constant 0.000000e+00 : f32
      %12 = vector.broadcast %cst_10 : f32 to vector<128x128xf32>
      %c0_11 = arith.constant 0 : index
      %c0_12 = arith.constant 0 : index
      %13 = vector.load %arg6[%c0_11, %c0_12] : memref<128x128xf32, #tpu.memory_space<vmem>>, vector<128x128xf32>
      tpu.vector_store %arg6[%c0_11, %c0_12], %12 {strides = array<i32>} : memref<128x128xf32, #tpu.memory_space<vmem>>, vector<128x128xf32>,
    } else {
    }
    %c0 = arith.constant 0 : index
    %c0_1 = arith.constant 0 : index
    %3 = vector.load %arg6[%c0, %c0_1] : memref<128x128xf32, #tpu.memory_space<vmem>>, vector<128x128xf32>
    %c0_2 = arith.constant 0 : index
    %c0_3 = arith.constant 0 : index
    %4 = vector.load %arg3[%c0_2, %c0_3] : memref<128x128xbf16, #tpu.memory_space<vmem>>, vector<128x128xbf16>
    %c0_4 = arith.constant 0 : index
    %c0_5 = arith.constant 0 : index
    %5 = vector.load %arg4[%c0_4, %c0_5] : memref<128x128xbf16, #tpu.memory_space<vmem>>, vector<128x128xbf16>
    %cst = arith.constant dense<0.000000e+00> : vector<128x128xf32>
    %6 = tpu.matmul %4, %5, %cst {dimension_numbers = #tpu.dot_dimension_numbers<[1], [0], [0], [1], [0, 0, 1, 1], [], []>} : vector<128x128xbf16>, vector<128x128xbf16>, vector<128x128xf32> -> vector<128x128xf32>
    %7 = arith.addf %3, %6 : vector<128x128xf32>
    %c0_6 = arith.constant 0 : index
    %c0_7 = arith.constant 0 : index
    %8 = vector.load %arg6[%c0_6, %c0_7] : memref<128x128xf32, #tpu.memory_space<vmem>>, vector<128x128xf32>
    tpu.vector_store %arg6[%c0_6, %c0_7], %7 {strides = array<i32>} : memref<128x128xf32, #tpu.memory_space<vmem>>, vector<128x128xf32>,
    %c0_i32_8 = arith.constant 0 : i32
    %9 = arith.cmpi eq, %arg2, %c0_i32_8 : i32
    %10 = arith.extui %9 : i1 to i32
    %c0_i32_9 = arith.constant 0 : i32
    %11 = arith.cmpi ne, %10, %c0_i32_9 : i32
    scf.if %11 {
      %c0_10 = arith.constant 0 : index
      %c0_11 = arith.constant 0 : index
      %12 = vector.load %arg6[%c0_10, %c0_11] : memref<128x128xf32, #tpu.memory_space<vmem>>, vector<128x128xf32>
      %13 = arith.truncf %12 : vector<128x128xf32> to vector<128x128xbf16>
      %c0_12 = arith.constant 0 : index
      %c0_13 = arith.constant 0 : index
      %14 = vector.load %arg5[%c0_12, %c0_13] : memref<128x128xbf16, #tpu.memory_space<vmem>>, vector<128x128xbf16>
      tpu.vector_store %arg5[%c0_12, %c0_13], %13 {strides = array<i32>} : memref<128x128xbf16, #tpu.memory_space<vmem>>, vector<128x128xbf16>,
    } else {
    }
    return
  }
  func.func @transform_0(%arg0: i32, %arg1: i32, %arg2: i32) -> (i32, i32) {
    %c0_i32 = arith.constant 0 : i32
    return %arg0, %arg2 : i32, i32
  }
  func.func @transform_1(%arg0: i32, %arg1: i32, %arg2: i32) -> (i32, i32) {
    %c0_i32 = arith.constant 0 : i32
    return %arg2, %arg1 : i32, i32
  }
  func.func @transform_2(%arg0: i32, %arg1: i32, %arg2: i32) -> (i32, i32) {
    %c0_i32 = arith.constant 0 : i32
    return %arg0, %arg1 : i32, i32
  }
}

</mosaic_0001>

<bundles_post_ra>
// kernel: tpu_custom_call.1
= control target key start
LH: loop header
LB: loop body
LE: loop exit
PB: predicated region body
PF: predicated region fallthrough
CT: control target
= control target key end

     0   :  { %7 = vsyncpa [#allocation4], 0  ;;  %s735_s0 = inlined_call_operand.hbm [shape: bf16[128,128], index: 0, kind: input, shape index: {}]   ;;  %s736_s1 = inlined_call_operand.hbm [shape: bf16[128,128], index: 1, kind: input, shape index: {}]   ;;  %s737_s2 = inlined_call_operand.hbm [shape: bf16[128,128], index: 2, kind: output, shape index: {}]  }
   0x1   :  { %8 = vsyncpa [#allocation7], 0 }
   0x2   :  { %9 = vsyncpa [#allocation5], 0  ;;  %s697_s9 = smov [#allocation3]  }
   0x3   :  { %s15_s10 = sshll.u32 %s697_s9, 4  ;;  %s16_s10 = int_to_ptr.vmem [resolvable:$true] %s15_s10 }
   0x4   :  { %s639_s11 = scalar_lea.vmem %s16_s10, 1024  ;;  %p644_p1 = scmp.lt.s32.totalorder %s16_s10, %s16_s10 }
   0x5   :  { %p640_p0 = scmp.ne.s32.totalorder %s16_s10, %s639_s11  ;;  %p645_p2 = scmp.lt.s32.totalorder %s639_s11, %s639_s11 }
   0x7   :  { %p646_p3 = por %p645_p2, %p644_p1 }
   0x9   :  { %p647_p4 = pnand %p646_p3, %p640_p0 }
   0xb   :  { %650 = shalt.err (!%p647_p4)
}
   0xc   :  { %s698_s12 = smov 64   ;;  %s699_s13 = smov 4  }
   0xd   :  { %21 = dma.hbm_to_vmem [thread:$0]  %s735_s0, 1024, %s16_s10, [#allocation4], %s698_s12, %s698_s12, %s699_s13  }
   0xe   :  { %s700_s16 = smov [#allocation6]  }
   0xf   :  { %s27_s17 = sshll.u32 %s700_s16, 4  ;;  %s28_s17 = int_to_ptr.vmem [resolvable:$true] %s27_s17 }
  0x10   :  { %s659_s18 = scalar_lea.vmem %s28_s17, 1024  ;;  %p664_p6 = scmp.lt.s32.totalorder %s28_s17, %s28_s17 }
  0x11   :  { %p660_p5 = scmp.ne.s32.totalorder %s28_s17, %s659_s18  ;;  %p665_p7 = scmp.lt.s32.totalorder %s659_s18, %s659_s18 }
  0x13   :  { %p666_p8 = por %p665_p7, %p664_p6 }
  0x15   :  { %p667_p9 = pnand %p666_p8, %p660_p5 }
  0x17   :  { %670 = shalt.err (!%p667_p9)
}
  0x18   :  { %33 = dma.hbm_to_vmem [thread:$0]  %s736_s1, 1024, %s28_s17, [#allocation7], %s698_s12, %s698_s12, %s699_s13  }
  0x19   :  { %691 = dma.done.wait [#allocation4], 1024  }
  0x1a   :  { %692 = vsyncadd [#allocation4], 4294966272 }
  0x1b   :  { %693 = dma.done.wait [#allocation7], 1024  }
  0x1c   :  { %694 = vsyncadd [#allocation7], 4294966272  ;;  %v615_v0 = vld [vmem:[#allocation6 + $0x38] sm:$0xff]   ;;  %v616_v1 = vld [vmem:[#allocation6 + $0x30] sm:$0xff]   ;;  %s701_s0 = smov [#allocation8]  }
  0x1d   :  { %562 = vmatprep.subr.bf16.mxu0 %v615_v0  ;;  %594 = vmatprep.subr.bf16.mxu1 %v615_v0  ;;  %v617_v2 = vld [vmem:[#allocation6 + $0x28] sm:$0xff]   ;;  %v618_v3 = vld [vmem:[#allocation6 + $0x20] sm:$0xff]   ;;  %v619_v6 = vld [vmem:[#allocation6 + $0x18] sm:$0xff]   ;;  %s438_s1 = sshll.u32 %s701_s0, 4  ;;  %s439_s1 = int_to_ptr.vmem [resolvable:$true] %s438_s1 }
  0x1e   :  { %563 = vmatpush3.bf16.msra.mxu0 %v615_v0  ;;  %602 = vmatpush3.bf16.msra.mxu1 %v615_v0  ;;  %v623_v4 = vld [vmem:[#allocation3] sm:$0xff]   ;;  %v620_v7 = vld [vmem:[#allocation6 + $0x10] sm:$0xff]   ;;  %v621_v8 = vld [vmem:[#allocation6 + $0x8] sm:$0xff]   ;;  %s671_s21 = scalar_lea.vmem %s439_s1, 1024  ;;  %p676_p11 = scmp.lt.s32.totalorder %s439_s1, %s439_s1 }
  0x1f   :  { %564 = vmatprep.subr.bf16.mxu0 %v616_v1  ;;  %595 = vmatprep.subr.bf16.mxu1 %v616_v1  ;;  %v624_v5 = vld [vmem:[#allocation3 + $0x20] sm:$0xff]   ;;  %v625_v10 = vld [vmem:[#allocation3 + $0x8] sm:$0xff]   ;;  %v627_v12 = vld [vmem:[#allocation3 + $0x10] sm:$0xff]   ;;  %p672_p10 = scmp.ne.s32.totalorder %s439_s1, %s671_s21  ;;  %p677_p12 = scmp.lt.s32.totalorder %s671_s21, %s671_s21 }
  0x20   :  { %578 = vmatprep.mubr.bf16.mxu0 %v623_v4  ;;  %586 = vmatprep.mubr.bf16.mxu1 %v624_v5  ;;  %v622_v9 = vld [vmem:[#allocation6] sm:$0xff]   ;;  %v626_v11 = vld [vmem:[#allocation3 + $0x28] sm:$0xff]   ;;  %v628_v13 = vld [vmem:[#allocation3 + $0x30] sm:$0xff]  }
  0x21   :  { %v629_v14 = vld [vmem:[#allocation3 + $0x18] sm:$0xff]   ;;  %p678_p13 = por %p677_p12, %p676_p11 }
  0x22   :  { %565 = vmatpush3.bf16.msra.mxu0 %v616_v1  ;;  %603 = vmatpush3.bf16.msra.mxu1 %v616_v1  ;;  %v630_v15 = vld [vmem:[#allocation3 + $0x38] sm:$0xff]  }
  0x23   :  { %566 = vmatprep.subr.bf16.mxu0 %v617_v2  ;;  %596 = vmatprep.subr.bf16.mxu1 %v617_v2  ;;  %p679_p0 = pnand %p678_p13, %p672_p10 }
  0x26   :  { %567 = vmatpush3.bf16.msra.mxu0 %v617_v2  ;;  %604 = vmatpush3.bf16.msra.mxu1 %v617_v2 }
  0x27   :  { %568 = vmatprep.subr.bf16.mxu0 %v618_v3  ;;  %597 = vmatprep.subr.bf16.mxu1 %v618_v3 }
  0x2a   :  { %569 = vmatpush3.bf16.msra.mxu0 %v618_v3  ;;  %605 = vmatpush3.bf16.msra.mxu1 %v618_v3 }
  0x2b   :  { %570 = vmatprep.subr.bf16.mxu0 %v619_v6  ;;  %598 = vmatprep.subr.bf16.mxu1 %v619_v6 }
  0x2e   :  { %571 = vmatpush3.bf16.msra.mxu0 %v619_v6  ;;  %606 = vmatpush3.bf16.msra.mxu1 %v619_v6 }
  0x2f   :  { %572 = vmatprep.subr.bf16.mxu0 %v620_v7  ;;  %599 = vmatprep.subr.bf16.mxu1 %v620_v7 }
  0x32   :  { %573 = vmatpush3.bf16.msra.mxu0 %v620_v7  ;;  %607 = vmatpush3.bf16.msra.mxu1 %v620_v7 }
  0x33   :  { %574 = vmatprep.subr.bf16.mxu0 %v621_v8  ;;  %600 = vmatprep.subr.bf16.mxu1 %v621_v8 }
  0x36   :  { %575 = vmatpush3.bf16.msra.mxu0 %v621_v8  ;;  %608 = vmatpush3.bf16.msra.mxu1 %v621_v8 }
  0x37   :  { %576 = vmatprep.subr.bf16.mxu0 %v622_v9  ;;  %601 = vmatprep.subr.bf16.mxu1 %v622_v9 }
  0x3a   :  { %577 = vmatpush3.bf16.msra.mxu0 %v622_v9  ;;  %609 = vmatpush3.bf16.msra.mxu1 %v622_v9 }
  0x3d   :  { %579 = vmatmul.mubr.bf16.vlgmr.msra.gmra.mxu0 %v625_v10  ;;  %587 = vmatmul.mubr.bf16.vlgmr.msra.gmra.mxu1 %v626_v11 }
  0x3e   :  { %582 = vmatprep.mubr.bf16.mxu0 %v627_v12  ;;  %590 = vmatprep.mubr.bf16.mxu1 %v628_v13 }
  0x45   :  { %583 = vmatmul.mubr.bf16.gmra.mxu0 %v629_v14  ;;  %591 = vmatmul.mubr.bf16.gmra.mxu1 %v630_v15 }
  0xfd   :  { %v580_v16 = vpop.f32.mrf.mxu0  ;;  %v588_v17 = vpop.f32.mrf.mxu1 }
  0xff   :  { %v239_v18 = vpop.f32.mrf.mxu0  ;;  %v271_v19 = vpop.f32.mrf.mxu1 }
 0x101   :  { %v581_v20 = vpop.f32.mrf.mxu0  ;;  %v589_v21 = vpop.f32.mrf.mxu1 }
 0x102   :  { %v507_v22 = vpack.c.bf16 %v581_v20, %v580_v16  ;;  %v527_v23 = vpack.c.bf16 %v589_v21, %v588_v17 }
 0x103   :  { %v242_v24 = vpop.f32.mrf.mxu0  ;;  %v274_v25 = vpop.f32.mrf.mxu1 }
 0x104   :  { %539 = vst [vmem:[#allocation8 + $0x8] sm:$0xff] %v507_v22   ;;  %543 = vst [vmem:[#allocation8 + $0x28] sm:$0xff] %v527_v23   ;;  %v502_v26 = vpack.c.bf16 %v242_v24, %v239_v18  ;;  %v522_v27 = vpack.c.bf16 %v274_v25, %v271_v19 }
 0x105   :  { %v584_v28 = vpop.f32.mrf.mxu0  ;;  %v592_v29 = vpop.f32.mrf.mxu1 }
 0x106   :  { %503 = vst [vmem:[#allocation8] sm:$0xff] %v502_v26   ;;  %542 = vst [vmem:[#allocation8 + $0x20] sm:$0xff] %v522_v27  }
 0x107   :  { %v255_v30 = vpop.f32.mrf.mxu0  ;;  %v287_v31 = vpop.f32.mrf.mxu1 }
 0x109   :  { %v585_v32 = vpop.f32.mrf.mxu0  ;;  %v593_v33 = vpop.f32.mrf.mxu1 }
 0x10a   :  { %v517_v34 = vpack.c.bf16 %v585_v32, %v584_v28  ;;  %v537_v35 = vpack.c.bf16 %v593_v33, %v592_v29 }
 0x10b   :  { %v258_v36 = vpop.f32.mrf.mxu0  ;;  %v290_v37 = vpop.f32.mrf.mxu1 }
 0x10c   :  { %541 = vst [vmem:[#allocation8 + $0x18] sm:$0xff] %v517_v34   ;;  %545 = vst [vmem:[#allocation8 + $0x38] sm:$0xff] %v537_v35   ;;  %v512_v38 = vpack.c.bf16 %v258_v36, %v255_v30  ;;  %v532_v39 = vpack.c.bf16 %v290_v37, %v287_v31 }
 0x10e   :  { %540 = vst [vmem:[#allocation8 + $0x10] sm:$0xff] %v512_v38   ;;  %544 = vst [vmem:[#allocation8 + $0x30] sm:$0xff] %v532_v39  }
 0x10f   :  { %682 = shalt.err (!%p679_p0)
}
 0x110   :  { %444 = dma.vmem_to_hbm [thread:$0]  %s439_s1, 1024, %s737_s2, [#allocation5], %s698_s12, %s698_s12, %s699_s13  }
 0x111   :  { %695 = dma.done.wait [#allocation5], 1024  }
 0x112   :  { %696 = vsyncadd [#allocation5], 4294966272 }
 0x113   :  { %448 = vsyncpa [#allocation4], 1 }
 0x114   :  { %449 = vsyncpa [#allocation7], 1 }
 0x115   :  { %450 = vsyncpa [#allocation5], 1 }

</bundles_post_ra>
